<compile_context>
chip_gen: v6e
topology: v6e:2x2x1
jax: 0.10.0
libtpu: 0.0.40
codegen_flags: <defaults>
</compile_context>

<pallas_src>
import functools
import math

import jax
import jax.numpy as jnp
from jax import lax
from jax.experimental import pallas as pl
from jax.experimental.pallas import tpu as pltpu


def _round_up(x, mult):
    return ((x + mult - 1) // mult) * mult


def _vmem_capacity_bytes():
    """Physical per-core VMEM (128 MiB on v5e/v6e, 64 MiB on v7x)."""
    try:
        info = pltpu.get_tpu_info()
        for name in ("vmem_capacity_bytes", "vmem_bytes", "vmem_size_bytes"):
            cap = getattr(info, name, None)
            if cap:
                return int(cap)
    except Exception:
        pass
    return 64 * 1024 * 1024  # conservative: assume a v7x-sized part


def _sin_from_cos(c):
    # |c| <= 0.1, so a 2-term even polynomial for sqrt(1 - c^2) is exact to
    # < 1e-7 and keeps the EUP slot (2 exps + 1 reciprocal) off the sqrt.
    c2 = c * c
    return 1.0 - 0.5 * c2 - 0.125 * (c2 * c2)


# ---------------------------------------------------------------------------
# Path 1: W resident in VMEM, batch streamed.
# ---------------------------------------------------------------------------
def _arcsoftmax_resident_kernel(x_ref, w_ref, out_ref, *, s, m, c_valid, c_pad):
    # x tile: (TM, F) f32 (streamed).  w: (F, Cp), column-normalized, scaled by
    # s and zero-padded in the wrapper; resident in VMEM (single buffer).
    x = x_ref[...].astype(jnp.float32)

    # F.normalize(x, dim=1) via the EUP rsqrt (eps keeps zero/padded rows finite).
    inv_nrm = lax.rsqrt(jnp.sum(x * x, axis=1, keepdims=True) + 1e-24)
    xn = (x * inv_nrm).astype(w_ref.dtype)

    # MXU matmul, f32 accumulation.  Because s is folded into W, this emits the
    # softmax exponent z_cos = s * cosa * 10 directly.
    z_cos = jnp.dot(xn, w_ref[...], preferred_element_type=jnp.float32)

    # cos(acos(c) + m) = c*cos(m) - sqrt(1 - c^2)*sin(m),  c = cosa = z_cos*(0.1/s)
    c = z_cos * (0.1 / s)
    sina = _sin_from_cos(c)
    z_marg = math.cos(m) * z_cos - (10.0 * s * math.sin(m)) * sina

    pad = c_pad - c_valid
    if s <= 40.0:
        # Analytic shift: z_cos in [-s, s] (unit-norm operands) -> no XLU
        # row-max reduce, and the zero-padded-column correction is a
        # compile-time constant (each padded column contributes exp(-s)).
        e_cosa = jnp.exp(z_cos - s)
        e_marg = jnp.exp(z_marg - s)
        row_sum = jnp.sum(e_cosa, axis=1, keepdims=True)
        if pad:
            row_sum = row_sum - pad * math.exp(-s)
    else:
        # ArcFace-scale s: keep the row-max shift to avoid f32 underflow.
        z_max = jnp.max(z_cos, axis=1, keepdims=True)
        e_cosa = jnp.exp(z_cos - z_max)
        e_marg = jnp.exp(z_marg - z_max)
        row_sum = jnp.sum(e_cosa, axis=1, keepdims=True)
        if pad:
            row_sum = row_sum - pad * jnp.exp(-z_max)

    denom = (row_sum - e_cosa) + e_marg
    out_ref[...] = (e_marg * pl.reciprocal(denom, approx=True)).astype(out_ref.dtype)


def _arcsoftmax_resident(x, w_prep, s, m, n, c, tm, c_pad, matmul_dtype,
                         out_dtype, vmem_limit):
    f = x.shape[1]
    n_pad = _round_up(n, tm)

    w_in = w_prep
    if c_pad != c:
        w_in = jnp.pad(w_in, ((0, 0), (0, c_pad - c)))
    w_in = w_in.astype(matmul_dtype)

    x_in = x.astype(jnp.float32)
    if n_pad != n:
        x_in = jnp.pad(x_in, ((0, n_pad - n), (0, 0)))

    kernel = functools.partial(_arcsoftmax_resident_kernel,
                               s=s, m=m, c_valid=c, c_pad=c_pad)

    out = pl.pallas_call(
        kernel,
        out_shape=jax.ShapeDtypeStruct((n_pad, c_pad), out_dtype),
        grid_spec=pltpu.PrefetchScalarGridSpec(
            num_scalar_prefetch=0,
            grid=(n_pad // tm,),
            in_specs=[
                # x: streamed per batch tile (auto double-buffered).
                pl.BlockSpec((tm, f), lambda i: (i, 0)),
                # W: constant block index -> single buffer (no wasted copy).
                pl.BlockSpec((f, c_pad), lambda i: (0, 0),
                             pipeline_mode=pl.Buffered(buffer_count=1)),
            ],
            out_specs=pl.BlockSpec((tm, c_pad), lambda i: (i, 0)),
        ),
        compiler_params=pltpu.CompilerParams(
            dimension_semantics=("parallel",),   # batch rows are independent
            vmem_limit_bytes=int(vmem_limit),
        ),
    )(x_in, w_in)
    return out[:n, :c]


# ---------------------------------------------------------------------------
# Path 2: class-tiled fallback (cls_num too large for a VMEM-resident W).
# ---------------------------------------------------------------------------
def _arcsoftmax_ctile_kernel(xn_ref, w_ref, emarg_ref, ecosa_ref, rowsum_ref,
                             *, s, m, pad_corr):
    # Grid = (batch tiles, class tiles); class axis last ("arbitrary").
    # xn: (TM, F) pre-normalized.  w tile: (F, TC) normalized and scaled by s.
    j = pl.program_id(1)

    z_cos = jnp.dot(xn_ref[...], w_ref[...], preferred_element_type=jnp.float32)
    c = z_cos * (0.1 / s)
    sina = _sin_from_cos(c)
    z_marg = math.cos(m) * z_cos - (10.0 * s * math.sin(m)) * sina

    # Analytic shift (z_cos in [-s, s]).
    # TODO(synk): for ArcFace-scale s (> ~40) add a row-max pre-pass; the
    # analytic shift can underflow f32 for rows with no aligned class.
    e_cosa = jnp.exp(z_cos - s)
    e_marg = jnp.exp(z_marg - s)
    emarg_ref[...] = e_marg
    ecosa_ref[...] = e_cosa

    @pl.when(j == 0)
    def _():
        # Start at -pad_corr: each zero-padded W column contributes exp(-s).
        rowsum_ref[...] = jnp.full(rowsum_ref.shape, -pad_corr, jnp.float32)

    rowsum_ref[...] += jnp.sum(e_cosa, axis=1, keepdims=True)


def _arcsoftmax_combine_kernel(emarg_ref, ecosa_ref, rowsum_ref, out_ref):
    e_marg = emarg_ref[...]
    denom = (rowsum_ref[...] - ecosa_ref[...]) + e_marg
    out_ref[...] = (e_marg * pl.reciprocal(denom, approx=True)).astype(out_ref.dtype)


def _arcsoftmax_class_tiled(x, w_prep, s, m, n, c, tm, class_tile,
                            matmul_dtype, out_dtype, vmem_limit):
    f = x.shape[1]
    itm = jnp.dtype(matmul_dtype).itemsize
    ito = jnp.dtype(out_dtype).itemsize

    tc = min(_round_up(c, 128), max(128, _round_up(class_tile, 128)))

    def ctile_bytes(tm_, tc_):
        return (2 * tm_ * f * itm            # normalized-x tiles
                + 2 * f * tc_ * itm          # streamed W tiles (double-buffered)
                + 2 * 2 * tm_ * tc_ * 4      # e_cosa / e_marg output tiles
                + 2 * tm_ * tc_ * ito        # final output tiles (pass 2)
                + 6 * tm_ * tc_ * 4          # live f32 temporaries
                + (1 << 20))                 # slack

    while tc > 128 and ctile_bytes(tm, tc) > vmem_limit:
        tc = max(128, _round_up(tc // 2, 128))
    while tm > 8 and ctile_bytes(tm, tc) > vmem_limit:
        tm = max(8, _round_up(tm // 2, 8))

    n_pad = _round_up(n, tm)
    c_pad = _round_up(c, tc)
    gm, gc = n_pad // tm, c_pad // tc
    pad_corr = float((c_pad - c) * math.exp(-s))

    # Row normalization of x hoisted here (O(n*f), negligible vs the O(n*c)
    # main pass) so the kernel body stays a pure matmul + epilogue.
    x_f32 = x.astype(jnp.float32)
    xn = x_f32 / jnp.maximum(jnp.linalg.norm(x_f32, axis=1, keepdims=True), 1e-12)
    xn = xn.astype(matmul_dtype)
    if n_pad != n:
        xn = jnp.pad(xn, ((0, n_pad - n), (0, 0)))

    w_in = w_prep
    if c_pad != c:
        w_in = jnp.pad(w_in, ((0, 0), (0, c_pad - c)))
    w_in = w_in.astype(matmul_dtype)

    kernel_a = functools.partial(_arcsoftmax_ctile_kernel, s=s, m=m,
                                 pad_corr=pad_corr)
    e_marg, e_cosa, row_sum = pl.pallas_call(
        kernel_a,
        out_shape=(
            jax.ShapeDtypeStruct((n_pad, c_pad), jnp.float32),
            jax.ShapeDtypeStruct((n_pad, c_pad), jnp.float32),
            jax.ShapeDtypeStruct((n_pad, 1), jnp.float32),
        ),
        grid_spec=pltpu.PrefetchScalarGridSpec(
            num_scalar_prefetch=0,
            grid=(gm, gc),
            in_specs=[
                pl.BlockSpec((tm, f), lambda i, j: (i, 0)),
                pl.BlockSpec((f, tc), lambda i, j: (0, j)),
            ],
            out_specs=[
                pl.BlockSpec((tm, tc), lambda i, j: (i, j)),
                pl.BlockSpec((tm, tc), lambda i, j: (i, j)),
                pl.BlockSpec((tm, 1), lambda i, j: (i, 0)),   # row-sum accumulator
            ],
        ),
        compiler_params=pltpu.CompilerParams(
            dimension_semantics=("parallel", "arbitrary"),
            vmem_limit_bytes=int(vmem_limit),
        ),
    )(xn, w_in)

    out = pl.pallas_call(
        _arcsoftmax_combine_kernel,
        out_shape=jax.ShapeDtypeStruct((n_pad, c_pad), out_dtype),
        grid_spec=pltpu.PrefetchScalarGridSpec(
            num_scalar_prefetch=0,
            grid=(gm, gc),
            in_specs=[
                pl.BlockSpec((tm, tc), lambda i, j: (i, j)),
                pl.BlockSpec((tm, tc), lambda i, j: (i, j)),
                pl.BlockSpec((tm, 1), lambda i, j: (i, 0)),
            ],
            out_specs=pl.BlockSpec((tm, tc), lambda i, j: (i, j)),
        ),
        compiler_params=pltpu.CompilerParams(
            dimension_semantics=("parallel", "parallel"),
            vmem_limit_bytes=int(vmem_limit),
        ),
    )(e_marg, e_cosa, row_sum)
    # TODO(synk): fuse the two passes (flash-style online denominator with
    # output rescale) to avoid the extra HBM round-trip of e_cosa/e_marg.
    return out[:n, :c]


# ---------------------------------------------------------------------------
# Wrapper
# ---------------------------------------------------------------------------
def arcsoftmax(x, w, s=1.0, m=0.2, *, tile_m=256, class_tile=2048,
               matmul_dtype=jnp.bfloat16, out_dtype=jnp.float32,
               force_class_tiled=False):
    """Arc-margin softmax forward.  x: (batch, feature), w: (feature, classes).

    matmul_dtype: pass jnp.float32 for ArcFace-scale s (>= ~32), where bf16
    operand rounding amplified by exp(s*delta) exceeds a few percent.
    out_dtype: bf16 halves HBM writeback on store-bound configs (e.g. v5e).
    """
    n, f = x.shape
    f2, c = w.shape
    assert f == f2, "feature dims must match"
    s = float(s)
    m = float(m)
    itm = jnp.dtype(matmul_dtype).itemsize
    ito = jnp.dtype(out_dtype).itemsize

    # One-shot W preparation (hoisted): F.normalize(w, dim=0), then fold the
    # scale s into W so the kernel epilogue never multiplies by s.
    w_f32 = w.astype(jnp.float32)
    w_prep = w_f32 / jnp.maximum(jnp.linalg.norm(w_f32, axis=0, keepdims=True), 1e-12)
    w_prep = w_prep * s

    # Generation-aware VMEM budget: 128 MiB on v5e/v6e, 64 MiB per-TC on v7x;
    # leave headroom for Mosaic internal scratch.
    cap = _vmem_capacity_bytes()
    budget = max(24 * 1024 * 1024, min(int(cap * 0.85), cap - 8 * 1024 * 1024))

    # Batch tile: aim for >= 4 grid steps so v7x's two TensorCores each get a
    # pipelined stream of >= 2 tiles; keep it a multiple of the sublane grain.
    n8 = _round_up(n, 8)
    tm0 = min(int(tile_m), max(8, _round_up(-(-n8 // 4), 8)))

    c_pad_res = _round_up(c, 128)

    def resident_bytes(tm_):
        return (2 * tm_ * f * 4               # streamed x tiles (f32, 2 buffers)
                + f * c_pad_res * itm         # resident W (single buffer)
                + 2 * tm_ * c_pad_res * ito   # output tiles (2 buffers)
                + 6 * tm_ * c_pad_res * 4     # live f32 epilogue temporaries
                + (1 << 20))                  # slack

    # Shrink tm until the resident footprint fits; fall back to class tiling
    # when even the smallest batch tile cannot hold W resident.
    tm_res = tm0
    while tm_res > 8 and resident_bytes(tm_res) > budget:
        tm_res = max(8, _round_up(tm_res // 2, 8))

    if not force_class_tiled and resident_bytes(tm_res) <= budget:
        return _arcsoftmax_resident(x, w_prep, s, m, n, c, tm_res, c_pad_res,
                                    matmul_dtype, out_dtype, budget)
    return _arcsoftmax_class_tiled(x, w_prep, s, m, n, c, tm0, int(class_tile),
                                   matmul_dtype, out_dtype, budget)


def arcsoftmax_ref(x, w, s=1.0, m=0.2):
    """Pure-JAX f32 reference mirroring the PyTorch module."""
    x_norm = x / jnp.maximum(jnp.linalg.norm(x, axis=1, keepdims=True), 1e-12)
    w_norm = w / jnp.maximum(jnp.linalg.norm(w, axis=0, keepdims=True), 1e-12)
    cosa = jnp.matmul(x_norm, w_norm) / 10.0
    a = jnp.arccos(jnp.clip(cosa, -1.0, 1.0))
    z_cos = s * cosa * 10.0
    z_marg = s * jnp.cos(a + m) * 10.0
    z_max = jnp.max(z_cos, axis=1, keepdims=True)  # shift-invariant form
    e_cosa = jnp.exp(z_cos - z_max)
    e_marg = jnp.exp(z_marg - z_max)
    return e_marg / (jnp.sum(e_cosa, axis=1, keepdims=True) - e_cosa + e_marg)


if __name__ == "__main__":
    key = jax.random.PRNGKey(0)
    kx, kw, kx2, kw2 = jax.random.split(key, 4)

    # Small, tile-friendly shapes: batch=8, feature_num=32, cls_num=128.
    batch, feature_num, cls_num = 8, 32, 128
    x = jax.random.normal(kx, (batch, feature_num), dtype=jnp.float32)
    w = jax.random.normal(kw, (feature_num, cls_num), dtype=jnp.float32)

    out = jax.block_until_ready(arcsoftmax(x, w, s=1.0, m=0.2))
    ref = arcsoftmax_ref(x, w, s=1.0, m=0.2)
    assert out.shape == (batch, cls_num)
    assert not jnp.any(jnp.isnan(out))
    # Tolerances account for bf16 MXU operands + EUP approx reciprocal.
    assert jnp.allclose(out, ref, rtol=3e-2, atol=3e-4), (
        f"resident path max abs err {jnp.max(jnp.abs(out - ref))}")

    # Exercise the class-tiled fallback (used when cls_num is too large for a
    # VMEM-resident W) at a small scale to validate it end-to-end.
    batch2, cls_num2 = 16, 384
    x2 = jax.random.normal(kx2, (batch2, feature_num), dtype=jnp.float32)
    w2 = jax.random.normal(kw2, (feature_num, cls_num2), dtype=jnp.float32)
    out2 = jax.block_until_ready(
        arcsoftmax(x2, w2, s=1.0, m=0.2, class_tile=128, force_class_tiled=True))
    ref2 = arcsoftmax_ref(x2, w2, s=1.0, m=0.2)
    assert out2.shape == (batch2, cls_num2)
    assert not jnp.any(jnp.isnan(out2))
    assert jnp.allclose(out2, ref2, rtol=3e-2, atol=3e-4), (
        f"class-tiled path max abs err {jnp.max(jnp.abs(out2 - ref2))}")

    print("KERNEL_OK")
</pallas_src>

<mosaic_0001>
module attributes {stable_mosaic.version = 11 : i64} {
  func.func @_arcsoftmax_resident_kernel(%arg0: i32, %arg1: memref<8x32xf32, #tpu.memory_space<vmem>>, %arg2: memref<32x128xbf16, #tpu.memory_space<vmem>>, %arg3: memref<8x128xf32, #tpu.memory_space<vmem>>) attributes {dimension_semantics = [#tpu.dimension_semantics<parallel>], iteration_bounds = array<i64: 1>, scalar_prefetch = 0 : i64, scratch_operands = 0 : i64, tpu.core_type = #tpu.core_type<tc>, window_params = [{transform_indices = @transform_0, window_bounds = array<i64: 8, 32>}, {pipeline_mode = #tpu.pipeline_mode<synchronous>, transform_indices = @transform_1, window_bounds = array<i64: 32, 128>}, {transform_indices = @transform_2, window_bounds = array<i64: 8, 128>}]} {
    %c0 = arith.constant 0 : index
    %c0_0 = arith.constant 0 : index
    %0 = vector.load %arg1[%c0, %c0_0] : memref<8x32xf32, #tpu.memory_space<vmem>>, vector<8x32xf32>
    %1 = arith.mulf %0, %0 : vector<8x32xf32>
    %cst = arith.constant dense<0.000000e+00> : vector<8xf32>
    %2 = vector.multi_reduction <add>, %1, %cst [1] : vector<8x32xf32> to vector<8xf32>
    %3 = vector.shape_cast %2 : vector<8xf32> to vector<8x1xf32>
    %cst_1 = arith.constant 1.000000e-24 : f32
    %4 = vector.broadcast %cst_1 : f32 to vector<8x1xf32>
    %5 = arith.addf %3, %4 : vector<8x1xf32>
    %6 = math.rsqrt %5 : vector<8x1xf32>
    %7 = vector.broadcast %6 : vector<8x1xf32> to vector<8x32xf32>
    %8 = arith.mulf %0, %7 : vector<8x32xf32>
    %9 = arith.truncf %8 : vector<8x32xf32> to vector<8x32xbf16>
    %c0_2 = arith.constant 0 : index
    %c0_3 = arith.constant 0 : index
    %10 = vector.load %arg2[%c0_2, %c0_3] : memref<32x128xbf16, #tpu.memory_space<vmem>>, vector<32x128xbf16>
    %cst_4 = arith.constant dense<0.000000e+00> : vector<8x128xf32>
    %11 = tpu.matmul %9, %10, %cst_4 {dimension_numbers = #tpu.dot_dimension_numbers<[1], [0], [0], [1], [0, 0, 1, 1], [], []>} : vector<8x32xbf16>, vector<32x128xbf16>, vector<8x128xf32> -> vector<8x128xf32>
    %cst_5 = arith.constant 1.000000e-01 : f32
    %12 = vector.broadcast %cst_5 : f32 to vector<8x128xf32>
    %13 = arith.mulf %11, %12 : vector<8x128xf32>
    %14 = arith.mulf %13, %13 : vector<8x128xf32>
    %cst_6 = arith.constant 5.000000e-01 : f32
    %15 = vector.broadcast %cst_6 : f32 to vector<8x128xf32>
    %16 = arith.mulf %15, %14 : vector<8x128xf32>
    %cst_7 = arith.constant 1.000000e+00 : f32
    %17 = vector.broadcast %cst_7 : f32 to vector<8x128xf32>
    %18 = arith.subf %17, %16 : vector<8x128xf32>
    %19 = arith.mulf %14, %14 : vector<8x128xf32>
    %cst_8 = arith.constant 1.250000e-01 : f32
    %20 = vector.broadcast %cst_8 : f32 to vector<8x128xf32>
    %21 = arith.mulf %20, %19 : vector<8x128xf32>
    %22 = arith.subf %18, %21 : vector<8x128xf32>
    %cst_9 = arith.constant 0.980066597 : f32
    %23 = vector.broadcast %cst_9 : f32 to vector<8x128xf32>
    %24 = arith.mulf %23, %11 : vector<8x128xf32>
    %cst_10 = arith.constant 1.98669326 : f32
    %25 = vector.broadcast %cst_10 : f32 to vector<8x128xf32>
    %26 = arith.mulf %25, %22 : vector<8x128xf32>
    %27 = arith.subf %24, %26 : vector<8x128xf32>
    %cst_11 = arith.constant 1.000000e+00 : f32
    %28 = vector.broadcast %cst_11 : f32 to vector<8x128xf32>
    %29 = arith.subf %11, %28 : vector<8x128xf32>
    %30 = math.exp %29 : vector<8x128xf32>
    %cst_12 = arith.constant 1.000000e+00 : f32
    %31 = vector.broadcast %cst_12 : f32 to vector<8x128xf32>
    %32 = arith.subf %27, %31 : vector<8x128xf32>
    %33 = math.exp %32 : vector<8x128xf32>
    %cst_13 = arith.constant dense<0.000000e+00> : vector<8xf32>
    %34 = vector.multi_reduction <add>, %30, %cst_13 [1] : vector<8x128xf32> to vector<8xf32>
    %35 = vector.shape_cast %34 : vector<8xf32> to vector<8x1xf32>
    %36 = vector.broadcast %35 : vector<8x1xf32> to vector<8x128xf32>
    %37 = arith.subf %36, %30 : vector<8x128xf32>
    %38 = arith.addf %37, %33 : vector<8x128xf32>
    %39 = tpu.reciprocal %38 {approx = true} : vector<8x128xf32> -> vector<8x128xf32>
    %40 = arith.mulf %33, %39 : vector<8x128xf32>
    %c0_14 = arith.constant 0 : index
    %c0_15 = arith.constant 0 : index
    %41 = vector.load %arg3[%c0_14, %c0_15] : memref<8x128xf32, #tpu.memory_space<vmem>>, vector<8x128xf32>
    tpu.vector_store %arg3[%c0_14, %c0_15], %40 {strides = array<i32>} : memref<8x128xf32, #tpu.memory_space<vmem>>, vector<8x128xf32>,
    return
  }
  func.func @transform_0(%arg0: i32) -> (i32, i32) {
    %c0_i32 = arith.constant 0 : i32
    %c0_i32_0 = arith.constant 0 : i32
    return %arg0, %c0_i32 : i32, i32
  }
  func.func @transform_1(%arg0: i32) -> (i32, i32) {
    %c0_i32 = arith.constant 0 : i32
    %c0_i32_0 = arith.constant 0 : i32
    %c0_i32_1 = arith.constant 0 : i32
    return %c0_i32, %c0_i32_0 : i32, i32
  }
  func.func @transform_2(%arg0: i32) -> (i32, i32) {
    %c0_i32 = arith.constant 0 : i32
    %c0_i32_0 = arith.constant 0 : i32
    return %arg0, %c0_i32 : i32, i32
  }
}

</mosaic_0001>

<bundles_post_ra>
// kernel: tpu_custom_call.1
= control target key start
LH: loop header
LB: loop body
LE: loop exit
PB: predicated region body
PF: predicated region fallthrough
CT: control target
= control target key end

     0   :  { %7 = vsyncpa [#allocation3], 0  ;;  %s279_s0 = inlined_call_operand.hbm [shape: f32[8,32], index: 0, kind: input, shape index: {}]   ;;  %s280_s1 = inlined_call_operand.hbm [shape: bf16[32,128], index: 1, kind: input, shape index: {}]   ;;  %s281_s2 = inlined_call_operand.hbm [shape: f32[8,128], index: 2, kind: output, shape index: {}]  }
   0x1   :  { %8 = vsyncpa [#allocation6], 0 }
   0x2   :  { %9 = vsyncpa [#allocation4], 0  ;;  %s246_s9 = smov [#allocation2]   ;;  %s247_s11 = smov [#allocation5]  }
   0x3   :  { %s16_s10 = sshll.u32 %s246_s9, 4  ;;  %s25_s12 = sshll.u32 %s247_s11, 4  ;;  %s17_s10 = int_to_ptr.vmem [resolvable:$true] %s16_s10  ;;  %s26_s12 = int_to_ptr.vmem [resolvable:$true] %s25_s12 }
   0x4   :  { %s188_s13 = scalar_lea.vmem %s17_s10, 128  ;;  %p193_p1 = scmp.lt.s32.totalorder %s17_s10, %s17_s10 }
   0x5   :  { %p189_p0 = scmp.ne.s32.totalorder %s17_s10, %s188_s13  ;;  %p194_p2 = scmp.lt.s32.totalorder %s188_s13, %s188_s13 }
   0x7   :  { %p195_p3 = por %p194_p2, %p193_p1 }
   0x9   :  { %p196_p4 = pnand %p195_p3, %p189_p0 }
   0xb   :  { %199 = shalt.err (!%p196_p4)
}
   0xc   :  { %19 = dma.hbm_to_vmem [thread:$0]  %s279_s0, 128, %s17_s10, [#allocation3]  }
   0xd   :  { %s208_s16 = scalar_lea.vmem %s26_s12, 256  ;;  %p213_p6 = scmp.lt.s32.totalorder %s26_s12, %s26_s12 }
   0xe   :  { %p209_p5 = scmp.ne.s32.totalorder %s26_s12, %s208_s16  ;;  %p214_p7 = scmp.lt.s32.totalorder %s208_s16, %s208_s16 }
  0x10   :  { %p215_p8 = por %p214_p7, %p213_p6 }
  0x12   :  { %p216_p9 = pnand %p215_p8, %p209_p5 }
  0x14   :  { %219 = shalt.err (!%p216_p9)
}
  0x15   :  { %s248_s17 = smov 64   ;;  %s249_s18 = smov 4  }
  0x16   :  { %31 = dma.hbm_to_vmem [thread:$0]  %s280_s1, 256, %s26_s12, [#allocation6], %s248_s17, %s248_s17, %s249_s18  }
  0x17   :  { %240 = dma.done.wait [#allocation3], 128  }
  0x18   :  { %241 = vsyncadd [#allocation3], 4294967168 }
  0x19   :  { %242 = dma.done.wait [#allocation6], 256  }
  0x1a   :  { %243 = vsyncadd [#allocation6], 4294967040  ;;  %v39_v0 = vld [vmem:[#allocation2] sm:$0xff]  ;;  %vm41_vm0 = vcmask 261120   ;;  %v170_v3 = vld [vmem:[#allocation5 + $0x8] sm:$0xff]   ;;  %v250_v4 = vmov 0.0  }
  0x1b   :  { %v40_v1 = vmul.f32 %v39_v0, %v39_v0  ;;  %155 = vmatprep.subr.bf16.mxu0 %v250_v4  ;;  %vm251_vm1 = vmmov 0   ;;  %v171_v5 = vld [vmem:[#allocation5] sm:$0xff]   ;;  %s252_s0 = smov [#allocation7]  }
  0x1c   :  { %159 = vmatprep.mubr.msk.bf16.mxu0 %vm251_vm1, %v250_v4  ;;  %156 = vmatpush3.bf16.msra.mxu0 %v170_v3  ;;  %s137_s1 = sshll.u32 %s252_s0, 4  ;;  %s138_s1 = int_to_ptr.vmem [resolvable:$true] %s137_s1 }
  0x1d   :  { %v42_v2 = vsel %vm41_vm0, %v40_v1, 0.0  ;;  %157 = vmatprep.subr.bf16.mxu0 %v250_v4  ;;  %s220_s21 = scalar_lea.vmem %s138_s1, 128  ;;  %p225_p11 = scmp.lt.s32.totalorder %s138_s1, %s138_s1 }
  0x1e   :  { %43 = vadd.xlane.f32.xlu0 %v42_v2  ;;  %p221_p10 = scmp.ne.s32.totalorder %s138_s1, %s220_s21  ;;  %p226_p12 = scmp.lt.s32.totalorder %s220_s21, %s220_s21 }
  0x20   :  { %158 = vmatpush3.bf16.msra.mxu0 %v171_v5  ;;  %p227_p13 = por %p226_p12, %p225_p11 }
  0x22   :  { %p228_p0 = pnand %p227_p13, %p221_p10 }
  0xa7   :  { %v44_v6 = vpop.xlane.xlu0 %43 }
  0xa8   :  { %v45_v7 = vadd.f32 1e-24, %v44_v6 }
  0xaa   :  { %172 = vrsqrt.f32 %v45_v7 }
  0xb7   :  { %v173_v8 = vpop.eup %172 }
  0xb8   :  { %v47_v9 = vmul.f32 %v173_v8, %v39_v0 }
  0xba   :  { %v48_v10 = vpack.c.bf16 %v47_v9, %v47_v9 }
  0xbc   :  { %160 = vmatmul.mubr.msk.bf16.vlgmr.msra.gmra.mxu0 %vm41_vm0, %v48_v10 }
 0x17c   :  { %v102_v11 = vpop.f32.mrf.mxu0 }
 0x17d   :  { %v150_v12 = vadd.f32 -1.0, %v102_v11  ;;  %v108_v18 = vmul.f32 0.1, %v102_v11  ;;  %v115_v26 = vmul.f32 0.9800666, %v102_v11 }
 0x17e   :  { %v161_v13 = vpop.f32.mrf.mxu0 }
 0x17f   :  { %v119_v14 = vmul.f32 1.442695, %v150_v12  ;;  %v109_v19 = vmul.f32 %v108_v18, %v108_v18 }
 0x180   :  { %v105_v15 = vpop.f32.mrf.mxu0 }
 0x181   :  { %174 = vpow2.f32 %v119_v14  ;;  %v110_v20 = vmul.f32 0.5, %v109_v19  ;;  %v112_v21 = vmul.f32 %v109_v19, %v109_v19 }
 0x182   :  { %v162_v16 = vpop.f32.mrf.mxu0 }
 0x183   :  { %v111_v22 = vsub.f32 1.0, %v110_v20  ;;  %v113_v23 = vmul.f32 0.125, %v112_v21 }
 0x185   :  { %v114_v24 = vsub.f32 %v111_v22, %v113_v23 }
 0x187   :  { %v116_v25 = vmul.f32 1.9866933, %v114_v24 }
 0x189   :  { %v117_v27 = vsub.f32 %v115_v26, %v116_v25 }
 0x18b   :  { %v151_v28 = vadd.f32 -1.0, %v117_v27 }
 0x18d   :  { %v122_v29 = vmul.f32 1.442695, %v151_v28 }
 0x18e   :  { %v175_v17 = vpop.eup %174 }
 0x18f   :  { %124 = vadd.xlane.f32.xlu0 %v175_v17  ;;  %176 = vpow2.f32 %v122_v29 }
 0x19c   :  { %v177_v32 = vpop.eup %176 }
 0x218   :  { %v125_v30 = vpop.xlane.xlu0 %124 }
 0x219   :  { %v126_v31 = vsub.f32 %v125_v30, %v175_v17 }
 0x21b   :  { %v127_v33 = vadd.f32 %v177_v32, %v126_v31 }
 0x21d   :  { %178 = vrcp.f32 %v127_v33 }
 0x22a   :  { %v179_v34 = vpop.eup %178 }
 0x22b   :  { %v129_v35 = vmul.f32 %v179_v34, %v177_v32 }
 0x22d   :  { %130 = vst [vmem:[#allocation7] sm:$0xff] %v129_v35 }
 0x22e   :  { %231 = shalt.err (!%p228_p0)
}
 0x22f   :  { %140 = dma.vmem_to_hbm [thread:$0]  %s138_s1, 128, %s281_s2, [#allocation4]  }
 0x230   :  { %244 = dma.done.wait [#allocation4], 128  }
 0x231   :  { %245 = vsyncadd [#allocation4], 4294967168 }
 0x232   :  { %144 = vsyncpa [#allocation3], 1 }
 0x233   :  { %145 = vsyncpa [#allocation6], 1 }
 0x234   :  { %146 = vsyncpa [#allocation4], 1 }

</bundles_post_ra>
